<compile_context>
chip_gen: v7x
topology: tpu7x:2x2x1
jax: 0.10.0
libtpu: 0.0.40
codegen_flags: <defaults>
</compile_context>

<pallas_src>
import jax
import jax.numpy as jnp
from jax.experimental import pallas as pl
from jax.experimental.pallas import tpu as pltpu


# ----------------------------- Pallas kernels -------------------------------

def _gap_kernel(low_ref, high_ref, lsum_ref, hsum_ref):
    """Spatially-tiled global sum for both inputs.

    low_ref/high_ref: (1, C, ts)   lsum_ref/hsum_ref: (1, C, 1) accumulators.
    Grid = (N, HW//ts); axis 1 is the ("arbitrary") reduction axis.
    """
    @pl.when(pl.program_id(1) == 0)
    def _():
        lsum_ref[...] = jnp.zeros_like(lsum_ref)
        hsum_ref[...] = jnp.zeros_like(hsum_ref)

    lsum_ref[...] += jnp.sum(low_ref[...].astype(jnp.float32), axis=2, keepdims=True)
    hsum_ref[...] += jnp.sum(high_ref[...].astype(jnp.float32), axis=2, keepdims=True)


def _apply_kernel(low_ref, high_ref, la1_ref, ha1_ref, lv_ref, flo_ref, fhi_ref):
    """Elementwise combine for both outputs.

      fea_high = high * high_att + high          = high * (1 + high_att)
      fea_low  = low * low_att + low_vec + low   = low * (1 + low_att) + low_vec

    low_ref/high_ref/flo_ref/fhi_ref: (1, C, ts) tiles (lanes = spatial).
    la1_ref/ha1_ref/lv_ref: (1, C, 1) per-batch vectors (broadcast over lanes);
    la1/ha1 are precomputed (1 + att) to save one add per element.
    """
    low = low_ref[0].astype(jnp.float32)      # (C, ts)
    high = high_ref[0].astype(jnp.float32)    # (C, ts)
    la1 = la1_ref[0]                          # (C, 1)
    ha1 = ha1_ref[0]                          # (C, 1)
    lv = lv_ref[0]                            # (C, 1)

    fhi_ref[0] = (high * ha1).astype(fhi_ref.dtype)
    flo_ref[0] = (low * la1 + lv).astype(flo_ref.dtype)


# ----------------------------- pallas_call wrappers --------------------------

def _pick_ts(hw, c, budget_bytes=8 << 20):
    """Largest spatial tile (multiple of 128 dividing HW) within a VMEM budget.

    Budget counts 4 f32 streams (2 in + 2 out), double-buffered.
    """
    if hw % 128 != 0:
        # TODO(synk): pad/mask the spatial dim to a multiple of 128 instead of
        #             falling back to one whole-row block per batch.
        return hw
    max_elems = budget_bytes // (4 * 2 * 4 * max(c, 1))
    cap = min(hw, 2048, max(128, (max_elems // 128) * 128))
    ts = cap
    while hw % ts != 0:
        ts -= 128
    return ts


def _gap_sums(low_f, high_f, ts):
    N, C, HW = low_f.shape
    return pl.pallas_call(
        _gap_kernel,
        out_shape=(jax.ShapeDtypeStruct((N, C, 1), jnp.float32),
                   jax.ShapeDtypeStruct((N, C, 1), jnp.float32)),
        grid=(N, HW // ts),
        in_specs=[pl.BlockSpec((1, C, ts), lambda i, j: (i, 0, j)),
                  pl.BlockSpec((1, C, ts), lambda i, j: (i, 0, j))],
        out_specs=(pl.BlockSpec((1, C, 1), lambda i, j: (i, 0, 0)),
                   pl.BlockSpec((1, C, 1), lambda i, j: (i, 0, 0))),
        compiler_params=pltpu.CompilerParams(
            dimension_semantics=("parallel", "arbitrary")),
    )(low_f, high_f)


def _apply(low_f, high_f, la1, ha1, lv, ts):
    N, C, HW = low_f.shape
    return pl.pallas_call(
        _apply_kernel,
        out_shape=(jax.ShapeDtypeStruct((N, C, HW), low_f.dtype),
                   jax.ShapeDtypeStruct((N, C, HW), high_f.dtype)),
        grid=(N, HW // ts),
        in_specs=[pl.BlockSpec((1, C, ts), lambda i, j: (i, 0, j)),
                  pl.BlockSpec((1, C, ts), lambda i, j: (i, 0, j)),
                  pl.BlockSpec((1, C, 1), lambda i, j: (i, 0, 0)),
                  pl.BlockSpec((1, C, 1), lambda i, j: (i, 0, 0)),
                  pl.BlockSpec((1, C, 1), lambda i, j: (i, 0, 0))],
        out_specs=(pl.BlockSpec((1, C, ts), lambda i, j: (i, 0, j)),
                   pl.BlockSpec((1, C, ts), lambda i, j: (i, 0, j))),
        compiler_params=pltpu.CompilerParams(
            dimension_semantics=("parallel", "parallel")),
    )(low_f, high_f, la1, ha1, lv)


# ----------------------------- parameters & glue -----------------------------

def _bn_fold(p, eps=1e-5):
    s = p["gamma"] / jnp.sqrt(p["var"] + eps)
    return s, p["beta"] - p["mean"] * s


def _branch(v, w1, b1, bn1, w2, b2, bn2):
    """1x1 conv -> BN -> ReLU -> 1x1 conv -> BN on a (N, C) GAP vector."""
    s1, t1 = _bn_fold(bn1)
    s2, t2 = _bn_fold(bn2)
    h = jnp.maximum((v @ w1.T + b1) * s1 + t1, 0.0)
    return (h @ w2.T + b2) * s2 + t2


def init_params(key, c, r=16):
    cr = max(1, c // r)
    ks = jax.random.split(key, 12)

    def nrm(k, shape, scale=0.1):
        return scale * jax.random.normal(k, shape, jnp.float32)

    def bn(k, n):
        k1, k2, k3, k4 = jax.random.split(k, 4)
        return dict(gamma=1.0 + 0.1 * jax.random.normal(k1, (n,), jnp.float32),
                    beta=0.1 * jax.random.normal(k2, (n,), jnp.float32),
                    mean=0.1 * jax.random.normal(k3, (n,), jnp.float32),
                    var=1.0 + 0.2 * jax.random.uniform(k4, (n,), jnp.float32))

    return dict(
        fc_low_w=nrm(ks[0], (cr, c)), fc_low_b=nrm(ks[1], (cr,)),
        bn_low_1=bn(ks[2], cr),
        fcs0_w=nrm(ks[3], (c, cr)), fcs0_b=nrm(ks[4], (c,)),
        bn_low_2=bn(ks[5], c),
        fc_high_w=nrm(ks[6], (cr, c)), fc_high_b=nrm(ks[7], (cr,)),
        bn_high_1=bn(ks[8], cr),
        fcs1_w=nrm(ks[9], (c, cr)), fcs1_b=nrm(ks[10], (c,)),
        bn_high_2=bn(ks[11], c),
    )


def frequency_dynamic_depose(params, low, high):
    """Pallas forward of Frequency_dynamic_depose. Returns (fea_low, fea_high)."""
    N, C, H, W = low.shape
    HW = H * W
    low_f = low.reshape(N, C, HW)      # free reshape, stays NCHW-contiguous
    high_f = high.reshape(N, C, HW)
    ts = _pick_ts(HW, C)

    # --- pass 1: global average pool (sum kernel, fused for both inputs) ----
    lsum, hsum = _gap_sums(low_f, high_f, ts)
    inv_hw = 1.0 / float(HW)
    gap_low = lsum[:, :, 0] * inv_hw               # (N, C)
    gap_high = hsum[:, :, 0] * inv_hw              # (N, C)

    # --- tiny per-batch branches (conv1x1 / BN / ReLU / conv1x1 / BN) -------
    low_vec = _branch(gap_low, params["fc_low_w"], params["fc_low_b"],
                      params["bn_low_1"], params["fcs0_w"], params["fcs0_b"],
                      params["bn_low_2"])
    high_vec = _branch(gap_high, params["fc_high_w"], params["fc_high_b"],
                       params["bn_high_1"], params["fcs1_w"], params["fcs1_b"],
                       params["bn_high_2"])
    la1 = (jax.nn.softmax(low_vec, axis=1) + 1.0).reshape(N, C, 1)
    ha1 = (jax.nn.softmax(high_vec, axis=1) + 1.0).reshape(N, C, 1)
    lv = low_vec.reshape(N, C, 1)

    # --- pass 2: elementwise combine for both outputs ------------------------
    flo, fhi = _apply(low_f, high_f, la1, ha1, lv, ts)
    return flo.reshape(N, C, H, W), fhi.reshape(N, C, H, W)


# ----------------------------- pure-JAX reference ----------------------------

def _reference(params, low, high):
    gl = jnp.mean(low, axis=(2, 3))
    gh = jnp.mean(high, axis=(2, 3))
    lv = _branch(gl, params["fc_low_w"], params["fc_low_b"], params["bn_low_1"],
                 params["fcs0_w"], params["fcs0_b"], params["bn_low_2"])
    hv = _branch(gh, params["fc_high_w"], params["fc_high_b"], params["bn_high_1"],
                 params["fcs1_w"], params["fcs1_b"], params["bn_high_2"])
    la = jax.nn.softmax(lv, axis=1)[:, :, None, None]
    ha = jax.nn.softmax(hv, axis=1)[:, :, None, None]
    fea_low = low * la + lv[:, :, None, None] + low
    fea_high = high * ha + high
    return fea_low, fea_high


# ----------------------------------- main ------------------------------------

if __name__ == "__main__":
    key = jax.random.PRNGKey(0)
    kp, kl, kh = jax.random.split(key, 3)

    N, C, H, W = 2, 64, 16, 16      # r=16 -> hidden = 4
    params = init_params(kp, C, r=16)
    low = jax.random.normal(kl, (N, C, H, W), dtype=jnp.float32)
    high = jax.random.normal(kh, (N, C, H, W), dtype=jnp.float32)

    fea_low, fea_high = jax.jit(frequency_dynamic_depose)(params, low, high)
    (fea_low, fea_high) = jax.block_until_ready((fea_low, fea_high))

    assert fea_low.shape == (N, C, H, W) and fea_high.shape == (N, C, H, W)
    assert bool(jnp.all(jnp.isfinite(fea_low))) and bool(jnp.all(jnp.isfinite(fea_high)))

    ref_low, ref_high = _reference(params, low, high)
    assert bool(jnp.allclose(fea_low, ref_low, rtol=1e-4, atol=1e-4))
    assert bool(jnp.allclose(fea_high, ref_high, rtol=1e-4, atol=1e-4))

    print("KERNEL_OK")
</pallas_src>

<mosaic_0001>
module attributes {stable_mosaic.version = 11 : i64} {
  func.func @_gap_kernel(%arg0: i32, %arg1: i32, %arg2: memref<1x64x256xf32, #tpu.memory_space<vmem>>, %arg3: memref<1x64x256xf32, #tpu.memory_space<vmem>>, %arg4: memref<1x64x1xf32, #tpu.memory_space<vmem>>, %arg5: memref<1x64x1xf32, #tpu.memory_space<vmem>>) attributes {dimension_semantics = [#tpu.dimension_semantics<parallel>, #tpu.dimension_semantics<arbitrary>], iteration_bounds = array<i64: 2, 1>, scalar_prefetch = 0 : i64, scratch_operands = 0 : i64, tpu.core_type = #tpu.core_type<tc>, window_params = [{transform_indices = @transform_0, window_bounds = array<i64: 1, 64, 256>}, {transform_indices = @transform_1, window_bounds = array<i64: 1, 64, 256>}, {transform_indices = @transform_2, window_bounds = array<i64: 1, 64, 1>}, {transform_indices = @transform_3, window_bounds = array<i64: 1, 64, 1>}]} {
    %c0_i32 = arith.constant 0 : i32
    %0 = arith.cmpi eq, %arg1, %c0_i32 : i32
    %1 = arith.extui %0 : i1 to i32
    %c0_i32_0 = arith.constant 0 : i32
    %2 = arith.cmpi ne, %1, %c0_i32_0 : i32
    scf.if %2 {
      %cst_19 = arith.constant 0.000000e+00 : f32
      %15 = vector.broadcast %cst_19 : f32 to vector<1x64x1xf32>
      %c0_20 = arith.constant 0 : index
      %c0_21 = arith.constant 0 : index
      %c0_22 = arith.constant 0 : index
      %16 = vector.load %arg4[%c0_20, %c0_21, %c0_22] : memref<1x64x1xf32, #tpu.memory_space<vmem>>, vector<1x64x1xf32>
      tpu.vector_store %arg4[%c0_20, %c0_21, %c0_22], %15 {strides = array<i32>} : memref<1x64x1xf32, #tpu.memory_space<vmem>>, vector<1x64x1xf32>,
      %cst_23 = arith.constant 0.000000e+00 : f32
      %17 = vector.broadcast %cst_23 : f32 to vector<1x64x1xf32>
      %c0_24 = arith.constant 0 : index
      %c0_25 = arith.constant 0 : index
      %c0_26 = arith.constant 0 : index
      %18 = vector.load %arg5[%c0_24, %c0_25, %c0_26] : memref<1x64x1xf32, #tpu.memory_space<vmem>>, vector<1x64x1xf32>
      tpu.vector_store %arg5[%c0_24, %c0_25, %c0_26], %17 {strides = array<i32>} : memref<1x64x1xf32, #tpu.memory_space<vmem>>, vector<1x64x1xf32>,
    } else {
    }
    %c0 = arith.constant 0 : index
    %c0_1 = arith.constant 0 : index
    %c0_2 = arith.constant 0 : index
    %3 = vector.load %arg4[%c0, %c0_1, %c0_2] : memref<1x64x1xf32, #tpu.memory_space<vmem>>, vector<1x64x1xf32>
    %c0_3 = arith.constant 0 : index
    %c0_4 = arith.constant 0 : index
    %c0_5 = arith.constant 0 : index
    %4 = vector.load %arg2[%c0_3, %c0_4, %c0_5] : memref<1x64x256xf32, #tpu.memory_space<vmem>>, vector<1x64x256xf32>
    %cst = arith.constant dense<0.000000e+00> : vector<1x64xf32>
    %5 = vector.multi_reduction <add>, %4, %cst [2] : vector<1x64x256xf32> to vector<1x64xf32>
    %6 = vector.shape_cast %5 : vector<1x64xf32> to vector<1x64x1xf32>
    %7 = arith.addf %3, %6 : vector<1x64x1xf32>
    %c0_6 = arith.constant 0 : index
    %c0_7 = arith.constant 0 : index
    %c0_8 = arith.constant 0 : index
    %8 = vector.load %arg4[%c0_6, %c0_7, %c0_8] : memref<1x64x1xf32, #tpu.memory_space<vmem>>, vector<1x64x1xf32>
    tpu.vector_store %arg4[%c0_6, %c0_7, %c0_8], %7 {strides = array<i32>} : memref<1x64x1xf32, #tpu.memory_space<vmem>>, vector<1x64x1xf32>,
    %c0_9 = arith.constant 0 : index
    %c0_10 = arith.constant 0 : index
    %c0_11 = arith.constant 0 : index
    %9 = vector.load %arg5[%c0_9, %c0_10, %c0_11] : memref<1x64x1xf32, #tpu.memory_space<vmem>>, vector<1x64x1xf32>
    %c0_12 = arith.constant 0 : index
    %c0_13 = arith.constant 0 : index
    %c0_14 = arith.constant 0 : index
    %10 = vector.load %arg3[%c0_12, %c0_13, %c0_14] : memref<1x64x256xf32, #tpu.memory_space<vmem>>, vector<1x64x256xf32>
    %cst_15 = arith.constant dense<0.000000e+00> : vector<1x64xf32>
    %11 = vector.multi_reduction <add>, %10, %cst_15 [2] : vector<1x64x256xf32> to vector<1x64xf32>
    %12 = vector.shape_cast %11 : vector<1x64xf32> to vector<1x64x1xf32>
    %13 = arith.addf %9, %12 : vector<1x64x1xf32>
    %c0_16 = arith.constant 0 : index
    %c0_17 = arith.constant 0 : index
    %c0_18 = arith.constant 0 : index
    %14 = vector.load %arg5[%c0_16, %c0_17, %c0_18] : memref<1x64x1xf32, #tpu.memory_space<vmem>>, vector<1x64x1xf32>
    tpu.vector_store %arg5[%c0_16, %c0_17, %c0_18], %13 {strides = array<i32>} : memref<1x64x1xf32, #tpu.memory_space<vmem>>, vector<1x64x1xf32>,
    return
  }
  func.func @transform_0(%arg0: i32, %arg1: i32) -> (i32, i32, i32) {
    %c0_i32 = arith.constant 0 : i32
    %c0_i32_0 = arith.constant 0 : i32
    return %arg0, %c0_i32, %arg1 : i32, i32, i32
  }
  func.func @transform_1(%arg0: i32, %arg1: i32) -> (i32, i32, i32) {
    %c0_i32 = arith.constant 0 : i32
    %c0_i32_0 = arith.constant 0 : i32
    return %arg0, %c0_i32, %arg1 : i32, i32, i32
  }
  func.func @transform_2(%arg0: i32, %arg1: i32) -> (i32, i32, i32) {
    %c0_i32 = arith.constant 0 : i32
    %c0_i32_0 = arith.constant 0 : i32
    %c0_i32_1 = arith.constant 0 : i32
    return %arg0, %c0_i32, %c0_i32_0 : i32, i32, i32
  }
  func.func @transform_3(%arg0: i32, %arg1: i32) -> (i32, i32, i32) {
    %c0_i32 = arith.constant 0 : i32
    %c0_i32_0 = arith.constant 0 : i32
    %c0_i32_1 = arith.constant 0 : i32
    return %arg0, %c0_i32, %c0_i32_0 : i32, i32, i32
  }
}

module attributes {stable_mosaic.version = 11 : i64} {
  func.func @_apply_kernel(%arg0: i32, %arg1: i32, %arg2: memref<1x64x256xf32, #tpu.memory_space<vmem>>, %arg3: memref<1x64x256xf32, #tpu.memory_space<vmem>>, %arg4: memref<1x64x1xf32, #tpu.memory_space<vmem>>, %arg5: memref<1x64x1xf32, #tpu.memory_space<vmem>>, %arg6: memref<1x64x1xf32, #tpu.memory_space<vmem>>, %arg7: memref<1x64x256xf32, #tpu.memory_space<vmem>>, %arg8: memref<1x64x256xf32, #tpu.memory_space<vmem>>) attributes {dimension_semantics = [#tpu.dimension_semantics<parallel>, #tpu.dimension_semantics<parallel>], iteration_bounds = array<i64: 2, 1>, scalar_prefetch = 0 : i64, scratch_operands = 0 : i64, tpu.core_type = #tpu.core_type<tc>, window_params = [{transform_indices = @transform_0, window_bounds = array<i64: 1, 64, 256>}, {transform_indices = @transform_1, window_bounds = array<i64: 1, 64, 256>}, {transform_indices = @transform_2, window_bounds = array<i64: 1, 64, 1>}, {transform_indices = @transform_3, window_bounds = array<i64: 1, 64, 1>}, {transform_indices = @transform_4, window_bounds = array<i64: 1, 64, 1>}, {transform_indices = @transform_5, window_bounds = array<i64: 1, 64, 256>}, {transform_indices = @transform_6, window_bounds = array<i64: 1, 64, 256>}]} {
    %c0 = arith.constant 0 : index
    %c0_0 = arith.constant 0 : index
    %c0_1 = arith.constant 0 : index
    %0 = vector.load %arg2[%c0, %c0_0, %c0_1] : memref<1x64x256xf32, #tpu.memory_space<vmem>>, vector<1x64x256xf32>
    %1 = vector.shape_cast %0 : vector<1x64x256xf32> to vector<64x256xf32>
    %c0_2 = arith.constant 0 : index
    %c0_3 = arith.constant 0 : index
    %c0_4 = arith.constant 0 : index
    %2 = vector.load %arg3[%c0_2, %c0_3, %c0_4] : memref<1x64x256xf32, #tpu.memory_space<vmem>>, vector<1x64x256xf32>
    %3 = vector.shape_cast %2 : vector<1x64x256xf32> to vector<64x256xf32>
    %c0_5 = arith.constant 0 : index
    %c0_6 = arith.constant 0 : index
    %c0_7 = arith.constant 0 : index
    %4 = vector.load %arg4[%c0_5, %c0_6, %c0_7] : memref<1x64x1xf32, #tpu.memory_space<vmem>>, vector<1x64x1xf32>
    %5 = vector.shape_cast %4 : vector<1x64x1xf32> to vector<64x1xf32>
    %c0_8 = arith.constant 0 : index
    %c0_9 = arith.constant 0 : index
    %c0_10 = arith.constant 0 : index
    %6 = vector.load %arg5[%c0_8, %c0_9, %c0_10] : memref<1x64x1xf32, #tpu.memory_space<vmem>>, vector<1x64x1xf32>
    %7 = vector.shape_cast %6 : vector<1x64x1xf32> to vector<64x1xf32>
    %c0_11 = arith.constant 0 : index
    %c0_12 = arith.constant 0 : index
    %c0_13 = arith.constant 0 : index
    %8 = vector.load %arg6[%c0_11, %c0_12, %c0_13] : memref<1x64x1xf32, #tpu.memory_space<vmem>>, vector<1x64x1xf32>
    %9 = vector.shape_cast %8 : vector<1x64x1xf32> to vector<64x1xf32>
    %10 = vector.broadcast %7 : vector<64x1xf32> to vector<64x256xf32>
    %11 = arith.mulf %3, %10 : vector<64x256xf32>
    %c0_14 = arith.constant 0 : index
    %c0_15 = arith.constant 0 : index
    %c0_16 = arith.constant 0 : index
    %12 = vector.load %arg8[%c0_14, %c0_15, %c0_16] : memref<1x64x256xf32, #tpu.memory_space<vmem>>, vector<1x64x256xf32>
    %13 = vector.shape_cast %12 : vector<1x64x256xf32> to vector<64x256xf32>
    %14 = vector.shape_cast %11 : vector<64x256xf32> to vector<1x64x256xf32>
    tpu.vector_store %arg8[%c0_14, %c0_15, %c0_16], %14 {strides = array<i32>} : memref<1x64x256xf32, #tpu.memory_space<vmem>>, vector<1x64x256xf32>,
    %15 = vector.broadcast %5 : vector<64x1xf32> to vector<64x256xf32>
    %16 = arith.mulf %1, %15 : vector<64x256xf32>
    %17 = vector.broadcast %9 : vector<64x1xf32> to vector<64x256xf32>
    %18 = arith.addf %16, %17 : vector<64x256xf32>
    %c0_17 = arith.constant 0 : index
    %c0_18 = arith.constant 0 : index
    %c0_19 = arith.constant 0 : index
    %19 = vector.load %arg7[%c0_17, %c0_18, %c0_19] : memref<1x64x256xf32, #tpu.memory_space<vmem>>, vector<1x64x256xf32>
    %20 = vector.shape_cast %19 : vector<1x64x256xf32> to vector<64x256xf32>
    %21 = vector.shape_cast %18 : vector<64x256xf32> to vector<1x64x256xf32>
    tpu.vector_store %arg7[%c0_17, %c0_18, %c0_19], %21 {strides = array<i32>} : memref<1x64x256xf32, #tpu.memory_space<vmem>>, vector<1x64x256xf32>,
    return
  }
  func.func @transform_0(%arg0: i32, %arg1: i32) -> (i32, i32, i32) {
    %c0_i32 = arith.constant 0 : i32
    %c0_i32_0 = arith.constant 0 : i32
    return %arg0, %c0_i32, %arg1 : i32, i32, i32
  }
  func.func @transform_1(%arg0: i32, %arg1: i32) -> (i32, i32, i32) {
    %c0_i32 = arith.constant 0 : i32
    %c0_i32_0 = arith.constant 0 : i32
    return %arg0, %c0_i32, %arg1 : i32, i32, i32
  }
  func.func @transform_2(%arg0: i32, %arg1: i32) -> (i32, i32, i32) {
    %c0_i32 = arith.constant 0 : i32
    %c0_i32_0 = arith.constant 0 : i32
    %c0_i32_1 = arith.constant 0 : i32
    return %arg0, %c0_i32, %c0_i32_0 : i32, i32, i32
  }
  func.func @transform_3(%arg0: i32, %arg1: i32) -> (i32, i32, i32) {
    %c0_i32 = arith.constant 0 : i32
    %c0_i32_0 = arith.constant 0 : i32
    %c0_i32_1 = arith.constant 0 : i32
    return %arg0, %c0_i32, %c0_i32_0 : i32, i32, i32
  }
  func.func @transform_4(%arg0: i32, %arg1: i32) -> (i32, i32, i32) {
    %c0_i32 = arith.constant 0 : i32
    %c0_i32_0 = arith.constant 0 : i32
    %c0_i32_1 = arith.constant 0 : i32
    return %arg0, %c0_i32, %c0_i32_0 : i32, i32, i32
  }
  func.func @transform_5(%arg0: i32, %arg1: i32) -> (i32, i32, i32) {
    %c0_i32 = arith.constant 0 : i32
    %c0_i32_0 = arith.constant 0 : i32
    return %arg0, %c0_i32, %arg1 : i32, i32, i32
  }
  func.func @transform_6(%arg0: i32, %arg1: i32) -> (i32, i32, i32) {
    %c0_i32 = arith.constant 0 : i32
    %c0_i32_0 = arith.constant 0 : i32
    return %arg0, %c0_i32, %arg1 : i32, i32, i32
  }
}

</mosaic_0001>

<bundles_post_ra>
// kernel: frequency_dynamic_depose.2
= control target key start
LH: loop header
LB: loop body
LE: loop exit
PB: predicated region body
PF: predicated region fallthrough
CT: control target
= control target key end

     0   :  { %s607_s12 = smov 0   ;;  %s609_s13 = smov 0   ;;  %s774_s0 = inlined_call_operand.vmem [shape: f32[2,64,256], index: 0, kind: input, shape index: {}]   ;;  %s775_s1 = inlined_call_operand.vmem [shape: f32[2,64,256], index: 1, kind: input, shape index: {}]   ;;  %s776_s2 = inlined_call_operand.vmem [shape: f32[2,64,1], index: 2, kind: output, shape index: {0}]   ;;  %s777_s3 = inlined_call_operand.vmem [shape: f32[2,64,1], index: 3, kind: output, shape index: {1}]  }
   0x1   :  { %s611_s14 = smov 0  }
   0x2 LB: > { %s26_s15 = sadd.s32 1, %s580_s13  ;;  %p522_p0 = scmp.ge.s32.totalorder %s584_s14, 1  ;;  %s584_s14 = sphi %s611_s14, %s14_s14   ;;  %s580_s13 = sphi %s609_s13, %s779_s13   ;;  %s576_s12 = sphi %s607_s12, %s778_s12  }
   0x3   : > { %p28_p1 = scmp.ge.s32.totalorder %s26_s15, 2  ;;  %p176_p2 = scmp.lt.s32.totalorder %s584_s14, 3 }
   0x5   : > { %s781_s15 = smov (%p28_p1, %s26_s15), 0  ;;  %p177_p3 = pnand %p522_p0, %p176_p2 }
   0x6   : > { %p219_p4 = scmp.lt.s32.totalorder (!%p177_p3), %s576_s12, 1  ;;  %vm252_vm0 = vcmask (!%p177_p3), 7168   ;;  %v586_v3 = vmov (!%p177_p3), 0.0  }
   0x7   : > { %180 = sbr.rel (%p177_p3) target bundleno = 194 (0xc2), region = 28 }
   0xe   : > { %s783_s12 = smov (!%p219_p4, %s576_s12), 1 }
   0xf   : > { %s533_s16 = sshll.u32 %s783_s12, 7  ;;  %s535_s17 = sshll.u32 %s783_s12, 6 }
  0x10   : > { %s634_s20 = scalar_lea.vmem %s774_s0, %s533_s16  ;;  %s639_s23 = scalar_lea.vmem %s776_s2, %s535_s17 }
  0x11   : > { %s644_s26 = scalar_lea.vmem %s777_s3, %s535_s17  ;;  %v281_v0 = vld [vmem:[%s634_s20 + $0x20] sm:$0xff]  ;;  %v282_v1 = vld [vmem:[%s634_s20 + $0x28] sm:$0xff]  ;;  %255 = vst.msk [vmem:[%s639_s23 + $0x10] sm:$0xff] %vm252_vm0, %v586_v3  ;;  %253 = vst.msk [vmem:[%s639_s23] sm:$0xff] %vm252_vm0, %v586_v3  ;;  %s699_s29 = scalar_lea.vmem %s775_s1, %s533_s16 }
  0x12   : > { %v277_v2 = vld [vmem:[%s634_s20] sm:$0xff]  ;;  %254 = vst.msk [vmem:[%s639_s23 + $0x8] sm:$0xff] %vm252_vm0, %v586_v3  ;;  %256 = vst.msk [vmem:[%s639_s23 + $0x18] sm:$0xff] %vm252_vm0, %v586_v3  ;;  %v299_v4 = vadd.f32 %v282_v1, %v281_v0  ;;  %v278_v5 = vld [vmem:[%s634_s20 + $0x8] sm:$0xff] }
  0x13   : > { %257 = vst.msk [vmem:[%s639_s23 + $0x20] sm:$0xff] %vm252_vm0, %v586_v3  ;;  %258 = vst.msk [vmem:[%s639_s23 + $0x28] sm:$0xff] %vm252_vm0, %v586_v3  ;;  %v283_v6 = vld [vmem:[%s634_s20 + $0x30] sm:$0xff]  ;;  %v284_v7 = vld [vmem:[%s634_s20 + $0x38] sm:$0xff]  ;;  %v293_v8 = vadd.f32 %v278_v5, %v277_v2 }
  0x14   : > { %259 = vst.msk [vmem:[%s639_s23 + $0x30] sm:$0xff] %vm252_vm0, %v586_v3  ;;  %260 = vst.msk [vmem:[%s639_s23 + $0x38] sm:$0xff] %vm252_vm0, %v586_v3  ;;  %v279_v9 = vld [vmem:[%s634_s20 + $0x10] sm:$0xff]  ;;  %v280_v10 = vld [vmem:[%s634_s20 + $0x18] sm:$0xff]  ;;  %300 = vadd.xlane.f32.xlu1 %v299_v4  ;;  %v302_v11 = vadd.f32 %v284_v7, %v283_v6 }
  0x15   : > { %261 = vst.msk [vmem:[%s644_s26] sm:$0xff] %vm252_vm0, %v586_v3  ;;  %262 = vst.msk [vmem:[%s644_s26 + $0x8] sm:$0xff] %vm252_vm0, %v586_v3  ;;  %294 = vadd.xlane.f32.xlu0 %v293_v8  ;;  %v296_v12 = vadd.f32 %v280_v10, %v279_v9  ;;  %v287_v13 = vld [vmem:[%s634_s20 + $0x50] sm:$0xff]  ;;  %v288_v14 = vld [vmem:[%s634_s20 + $0x58] sm:$0xff] }
  0x16   : > { %263 = vst.msk [vmem:[%s644_s26 + $0x10] sm:$0xff] %vm252_vm0, %v586_v3  ;;  %264 = vst.msk [vmem:[%s644_s26 + $0x18] sm:$0xff] %vm252_vm0, %v586_v3  ;;  %v285_v15 = vld [vmem:[%s634_s20 + $0x40] sm:$0xff]  ;;  %v286_v16 = vld [vmem:[%s634_s20 + $0x48] sm:$0xff]  ;;  %v308_v17 = vadd.f32 %v288_v14, %v287_v13 }
  0x17   : > { %265 = vst.msk [vmem:[%s644_s26 + $0x20] sm:$0xff] %vm252_vm0, %v586_v3  ;;  %266 = vst.msk [vmem:[%s644_s26 + $0x28] sm:$0xff] %vm252_vm0, %v586_v3  ;;  %v305_v18 = vadd.f32 %v286_v16, %v285_v15  ;;  %v291_v19 = vld [vmem:[%s634_s20 + $0x70] sm:$0xff]  ;;  %v292_v20 = vld [vmem:[%s634_s20 + $0x78] sm:$0xff] }
  0x18   : > { %267 = vst.msk [vmem:[%s644_s26 + $0x30] sm:$0xff] %vm252_vm0, %v586_v3  ;;  %268 = vst.msk [vmem:[%s644_s26 + $0x38] sm:$0xff] %vm252_vm0, %v586_v3  ;;  %303 = vadd.xlane.f32.xlu1 %v302_v11  ;;  %v289_v21 = vld [vmem:[%s634_s20 + $0x60] sm:$0xff]  ;;  %v290_v22 = vld [vmem:[%s634_s20 + $0x68] sm:$0xff]  ;;  %v314_v23 = vadd.f32 %v292_v20, %v291_v19 }
  0x19   : > { %297 = vadd.xlane.f32.xlu0 %v296_v12  ;;  %v311_v24 = vadd.f32 %v290_v22, %v289_v21  ;;  %v344_v25 = vld [vmem:[%s699_s29 + $0x10] sm:$0xff]  ;;  %v345_v26 = vld [vmem:[%s699_s29 + $0x18] sm:$0xff]  ;;  %v342_v27 = vld [vmem:[%s699_s29] sm:$0xff] }
  0x1a   : > { %v343_v28 = vld [vmem:[%s699_s29 + $0x8] sm:$0xff]  ;;  %v361_v29 = vadd.f32 %v345_v26, %v344_v25  ;;  %v348_v31 = vld [vmem:[%s699_s29 + $0x30] sm:$0xff]  ;;  %v349_v32 = vld [vmem:[%s699_s29 + $0x38] sm:$0xff] }
  0x1b   : > { %v358_v30 = vadd.f32 %v343_v28, %v342_v27  ;;  %v346_v33 = vld [vmem:[%s699_s29 + $0x20] sm:$0xff]  ;;  %v347_v34 = vld [vmem:[%s699_s29 + $0x28] sm:$0xff]  ;;  %v367_v35 = vadd.f32 %v349_v32, %v348_v31  ;;  %v352_v37 = vld [vmem:[%s699_s29 + $0x50] sm:$0xff] }
  0x1c   : > { %309 = vadd.xlane.f32.xlu1 %v308_v17  ;;  %v364_v36 = vadd.f32 %v347_v34, %v346_v33  ;;  %v353_v38 = vld [vmem:[%s699_s29 + $0x58] sm:$0xff]  ;;  %v350_v39 = vld [vmem:[%s699_s29 + $0x40] sm:$0xff]  ;;  %v351_v40 = vld [vmem:[%s699_s29 + $0x48] sm:$0xff] }
  0x1d   : > { %306 = vadd.xlane.f32.xlu0 %v305_v18  ;;  %v373_v41 = vadd.f32 %v353_v38, %v352_v37  ;;  %v370_v42 = vadd.f32 %v351_v40, %v350_v39  ;;  %v356_v43 = vld [vmem:[%s699_s29 + $0x70] sm:$0xff]  ;;  %v357_v44 = vld [vmem:[%s699_s29 + $0x78] sm:$0xff]  ;;  %v354_v45 = vld [vmem:[%s699_s29 + $0x60] sm:$0xff] }
  0x1e   : > { %v355_v46 = vld [vmem:[%s699_s29 + $0x68] sm:$0xff]  ;;  %v379_v47 = vadd.f32 %v357_v44, %v356_v43  ;;  %v271_v49 = vld [vmem:[%s639_s23 + $0x10] sm:$0xff]  ;;  %v269_v50 = vld [vmem:[%s639_s23] sm:$0xff] }
  0x1f   : > { %v376_v48 = vadd.f32 %v355_v46, %v354_v45  ;;  %v272_v55 = vld [vmem:[%s639_s23 + $0x18] sm:$0xff]  ;;  %v270_v56 = vld [vmem:[%s639_s23 + $0x8] sm:$0xff]  ;;  %v273_v62 = vld [vmem:[%s639_s23 + $0x20] sm:$0xff] }
  0x20   : > { %315 = vadd.xlane.f32.xlu1 %v314_v23  ;;  %v274_v61 = vld [vmem:[%s639_s23 + $0x28] sm:$0xff]  ;;  %v276_v3 = vld [vmem:[%s639_s23 + $0x38] sm:$0xff]  ;;  %v275_v4 = vld [vmem:[%s639_s23 + $0x30] sm:$0xff] }
  0x21   : > { %312 = vadd.xlane.f32.xlu0 %v311_v24  ;;  %v335_v9 = vld [vmem:[%s644_s26 + $0x8] sm:$0xff]  ;;  %v334_v10 = vld [vmem:[%s644_s26] sm:$0xff]  ;;  %v337_v15 = vld [vmem:[%s644_s26 + $0x18] sm:$0xff] }
  0x22   : > { %v336_v16 = vld [vmem:[%s644_s26 + $0x10] sm:$0xff]  ;;  %v339_v21 = vld [vmem:[%s644_s26 + $0x28] sm:$0xff]  ;;  %v338_v22 = vld [vmem:[%s644_s26 + $0x20] sm:$0xff] }
  0x23   : > { %v341_v27 = vld [vmem:[%s644_s26 + $0x38] sm:$0xff]  ;;  %v340_v28 = vld [vmem:[%s644_s26 + $0x30] sm:$0xff] }
  0x24   : > { %362 = vadd.xlane.f32.xlu1 %v361_v29 }
  0x25   : > { %359 = vadd.xlane.f32.xlu0 %v358_v30 }
  0x28   : > { %368 = vadd.xlane.f32.xlu1 %v367_v35 }
  0x29   : > { %365 = vadd.xlane.f32.xlu0 %v364_v36 }
  0x2c   : > { %374 = vadd.xlane.f32.xlu1 %v373_v41 }
  0x2d   : > { %371 = vadd.xlane.f32.xlu0 %v370_v42 }
  0x30   : > { %380 = vadd.xlane.f32.xlu1 %v379_v47 }
  0x31   : > { %377 = vadd.xlane.f32.xlu0 %v376_v48 }
  0xa1   : > { %v301_v51 = vpop.xlane.xlu1 %300 }
  0xa2   : > { %v319_v52 = vadd.f32 %v301_v51, %v271_v49  ;;  %v295_v53 = vpop.xlane.xlu0 %294 }
  0xa3   : > { %v317_v54 = vadd.f32 %v295_v53, %v269_v50 }
  0xa4   : > { %328 = vst.msk [vmem:[%s639_s23 + $0x10] sm:$0xff] %vm252_vm0, %v319_v52 }
  0xa5   : > { %326 = vst.msk [vmem:[%s639_s23] sm:$0xff] %vm252_vm0, %v317_v54  ;;  %v304_v57 = vpop.xlane.xlu1 %303 }
  0xa6   : > { %v320_v58 = vadd.f32 %v304_v57, %v272_v55  ;;  %v298_v59 = vpop.xlane.xlu0 %297 }
  0xa7   : > { %v318_v60 = vadd.f32 %v298_v59, %v270_v56 }
  0xa8   : > { %329 = vst.msk [vmem:[%s639_s23 + $0x18] sm:$0xff] %vm252_vm0, %v320_v58 }
  0xa9   : > { %327 = vst.msk [vmem:[%s639_s23 + $0x8] sm:$0xff] %vm252_vm0, %v318_v60  ;;  %v310_v63 = vpop.xlane.xlu1 %309 }
  0xaa   : > { %v322_v0 = vadd.f32 %v310_v63, %v274_v61  ;;  %v307_v1 = vpop.xlane.xlu0 %306 }
  0xab   : > { %v321_v2 = vadd.f32 %v307_v1, %v273_v62 }
  0xac   : > { %331 = vst.msk [vmem:[%s639_s23 + $0x28] sm:$0xff] %vm252_vm0, %v322_v0 }
  0xad   : > { %330 = vst.msk [vmem:[%s639_s23 + $0x20] sm:$0xff] %vm252_vm0, %v321_v2  ;;  %v316_v5 = vpop.xlane.xlu1 %315 }
  0xae   : > { %v324_v6 = vadd.f32 %v316_v5, %v276_v3  ;;  %v313_v7 = vpop.xlane.xlu0 %312 }
  0xaf   : > { %v323_v8 = vadd.f32 %v313_v7, %v275_v4 }
  0xb0   : > { %333 = vst.msk [vmem:[%s639_s23 + $0x38] sm:$0xff] %vm252_vm0, %v324_v6 }
  0xb1   : > { %332 = vst.msk [vmem:[%s639_s23 + $0x30] sm:$0xff] %vm252_vm0, %v323_v8  ;;  %v363_v11 = vpop.xlane.xlu1 %362 }
  0xb2   : > { %v383_v12 = vadd.f32 %v363_v11, %v335_v9  ;;  %v360_v13 = vpop.xlane.xlu0 %359 }
  0xb3   : > { %v382_v14 = vadd.f32 %v360_v13, %v334_v10 }
  0xb4   : > { %391 = vst.msk [vmem:[%s644_s26 + $0x8] sm:$0xff] %vm252_vm0, %v383_v12 }
  0xb5   : > { %390 = vst.msk [vmem:[%s644_s26] sm:$0xff] %vm252_vm0, %v382_v14  ;;  %v369_v17 = vpop.xlane.xlu1 %368 }
  0xb6   : > { %v385_v18 = vadd.f32 %v369_v17, %v337_v15  ;;  %v366_v19 = vpop.xlane.xlu0 %365 }
  0xb7   : > { %v384_v20 = vadd.f32 %v366_v19, %v336_v16 }
  0xb8   : > { %393 = vst.msk [vmem:[%s644_s26 + $0x18] sm:$0xff] %vm252_vm0, %v385_v18 }
  0xb9   : > { %392 = vst.msk [vmem:[%s644_s26 + $0x10] sm:$0xff] %vm252_vm0, %v384_v20  ;;  %v375_v23 = vpop.xlane.xlu1 %374 }
  0xba   : > { %v387_v24 = vadd.f32 %v375_v23, %v339_v21  ;;  %v372_v25 = vpop.xlane.xlu0 %371 }
  0xbb   : > { %v386_v26 = vadd.f32 %v372_v25, %v338_v22 }
  0xbc   : > { %395 = vst.msk [vmem:[%s644_s26 + $0x28] sm:$0xff] %vm252_vm0, %v387_v24 }
  0xbd   : > { %394 = vst.msk [vmem:[%s644_s26 + $0x20] sm:$0xff] %vm252_vm0, %v386_v26  ;;  %v381_v29 = vpop.xlane.xlu1 %380 }
  0xbe   : > { %v389_v30 = vadd.f32 %v381_v29, %v341_v27  ;;  %v378_v31 = vpop.xlane.xlu0 %377 }
  0xbf   : > { %v388_v32 = vadd.f32 %v378_v31, %v340_v28 }
  0xc0   : > { %397 = vst.msk [vmem:[%s644_s26 + $0x38] sm:$0xff] %vm252_vm0, %v389_v30 }
  0xc1   : > { %396 = vst.msk [vmem:[%s644_s26 + $0x30] sm:$0xff] %vm252_vm0, %v388_v32 }
  0xc2 PF: > { %s14_s14 = sadd.s32 1, %s584_s14   ;;  %s778_s12 = smov %s580_s13 }
  0xc3   : > { %p11_p5 = scmp.ge.s32.totalorder %s14_s14, 4   ;;  %s779_s13 = smov %s781_s15 }
  0xc5   :  { %13 = sbr.rel (!%p11_p5) target bundleno = 2 (0x2), region = 77 }

// kernel: frequency_dynamic_depose.3
= control target key start
LH: loop header
LB: loop body
LE: loop exit
PB: predicated region body
PF: predicated region fallthrough
CT: control target
= control target key end

     0   :  { %s973_s21 = smov 0   ;;  %s975_s22 = smov 0   ;;  %s1122_s0 = inlined_call_operand.vmem [shape: f32[2,64,256], index: 0, kind: input, shape index: {}]   ;;  %s1123_s1 = inlined_call_operand.vmem [shape: f32[2,64,256], index: 1, kind: input, shape index: {}]   ;;  %s1124_s2 = inlined_call_operand.vmem [shape: f32[2,64,1], index: 2, kind: input, shape index: {}]   ;;  %s1125_s3 = inlined_call_operand.vmem [shape: f32[2,64,1], index: 3, kind: input, shape index: {}]   ;;  %s1126_s4 = inlined_call_operand.vmem [shape: f32[2,64,1], index: 4, kind: input, shape index: {}]   ;;  %s1127_s5 = inlined_call_operand.vmem [shape: f32[2,64,256], index: 5, kind: output, shape index: {0}]   ;;  %s1128_s6 = inlined_call_operand.vmem [shape: f32[2,64,256], index: 6, kind: output, shape index: {1}]  }
   0x1   :  { %s977_s23 = smov 0  }
   0x2 LB: > { %s29_s24 = sadd.s32 1, %s931_s22  ;;  %p862_p0 = scmp.ge.s32.totalorder %s935_s23, 1  ;;  %s935_s23 = sphi %s977_s23, %s17_s23   ;;  %s931_s22 = sphi %s975_s22, %s1130_s22   ;;  %s927_s21 = sphi %s973_s21, %s1129_s21  }
   0x3   : > { %p31_p1 = scmp.ge.s32.totalorder %s29_s24, 2  ;;  %p285_p2 = scmp.lt.s32.totalorder %s935_s23, 3 }
   0x5   : > { %s1132_s24 = smov (%p31_p1, %s29_s24), 0  ;;  %p286_p3 = pnand %p862_p0, %p285_p2 }
   0x6   : > { %p357_p4 = scmp.lt.s32.totalorder (!%p286_p3), %s927_s21, 1  ;;  %v937_v0 = vmov (!%p286_p3), 0  }
   0x7   : > { %289 = sbr.rel (%p286_p3) target bundleno = 194 (0xc2), region = 40  ;;  %912 = vset.pattern.permute.xlu1 (!%p286_p3), %v937_v0  ;;  %911 = vset.pattern.permute.xlu0 (!%p286_p3), %v937_v0 }
   0xe   : > { %s1134_s21 = smov (!%p357_p4, %s927_s21), 1 }
   0xf   : > { %s994_s25 = sshll.u32 %s1134_s21, 6  ;;  %s1019_s11 = sshll.u32 %s1134_s21, 7 }
  0x10   : > { %s1000_s28 = scalar_lea.vmem %s1125_s3, %s994_s25  ;;  %s380_s7 = scalar_lea.vmem %s1124_s2, %s994_s25 }
  0x11   : > { %v453_v1 = vld [vmem:[%s1000_s28 + $0x10] sm:$0xff]  ;;  %v451_v2 = vld [vmem:[%s1000_s28] sm:$0xff]  ;;  %v454_v3 = vld [vmem:[%s1000_s28 + $0x18] sm:$0xff]  ;;  %s390_s10 = scalar_lea.vmem %s1126_s4, %s994_s25  ;;  %s1025_s14 = scalar_lea.vmem %s1123_s1, %s1019_s11 }
  0x12   : > { %479 = vperm.xlu1 %912, %v453_v1   ;;  %469 = vperm.xlu0 %911, %v451_v2   ;;  %v452_v4 = vld [vmem:[%s1000_s28 + $0x8] sm:$0xff]  ;;  %v455_v6 = vld [vmem:[%s1000_s28 + $0x20] sm:$0xff]  ;;  %v457_v7 = vld [vmem:[%s1000_s28 + $0x30] sm:$0xff]  ;;  %s1035_s17 = scalar_lea.vmem %s1128_s6, %s1019_s11  ;;  %s1065_s20 = scalar_lea.vmem %s1122_s0, %s1019_s11 }
  0x13   : > { %v456_v5 = vld [vmem:[%s1000_s28 + $0x28] sm:$0xff]  ;;  %v443_v8 = vld [vmem:[%s380_s7] sm:$0xff]  ;;  %v445_v10 = vld [vmem:[%s380_s7 + $0x10] sm:$0xff]  ;;  %s1085_s26 = scalar_lea.vmem %s1127_s5, %s1019_s11 }
  0x14   : > { %v444_v9 = vld [vmem:[%s380_s7 + $0x8] sm:$0xff]  ;;  %v446_v11 = vld [vmem:[%s380_s7 + $0x18] sm:$0xff]  ;;  %v447_v12 = vld [vmem:[%s380_s7 + $0x20] sm:$0xff] }
  0x15   : > { %v448_v13 = vld [vmem:[%s380_s7 + $0x28] sm:$0xff]  ;;  %v449_v14 = vld [vmem:[%s380_s7 + $0x30] sm:$0xff]  ;;  %v450_v15 = vld [vmem:[%s380_s7 + $0x38] sm:$0xff] }
  0x16   : > { %484 = vperm.xlu1 %912, %v454_v3   ;;  %474 = vperm.xlu0 %911, %v452_v4   ;;  %v458_v16 = vld [vmem:[%s1000_s28 + $0x38] sm:$0xff]  ;;  %v459_v17 = vld [vmem:[%s390_s10] sm:$0xff]  ;;  %v460_v18 = vld [vmem:[%s390_s10 + $0x8] sm:$0xff] }
  0x17   : > { %v461_v19 = vld [vmem:[%s390_s10 + $0x10] sm:$0xff]  ;;  %v462_v20 = vld [vmem:[%s390_s10 + $0x18] sm:$0xff]  ;;  %v463_v21 = vld [vmem:[%s390_s10 + $0x20] sm:$0xff] }
  0x18   : > { %v464_v22 = vld [vmem:[%s390_s10 + $0x28] sm:$0xff]  ;;  %v465_v23 = vld [vmem:[%s390_s10 + $0x30] sm:$0xff]  ;;  %v466_v24 = vld [vmem:[%s390_s10 + $0x38] sm:$0xff] }
  0x19   : > { %v431_v25 = vld [vmem:[%s1025_s14 + $0x20] sm:$0xff]  ;;  %v432_v26 = vld [vmem:[%s1025_s14 + $0x28] sm:$0xff]  ;;  %v433_v35 = vld [vmem:[%s1025_s14 + $0x30] sm:$0xff] }
  0x1a   : > { %494 = vperm.xlu1 %912, %v456_v5   ;;  %489 = vperm.xlu0 %911, %v455_v6   ;;  %v427_v27 = vld [vmem:[%s1025_s14] sm:$0xff]  ;;  %v428_v28 = vld [vmem:[%s1025_s14 + $0x8] sm:$0xff]  ;;  %v434_v36 = vld [vmem:[%s1025_s14 + $0x38] sm:$0xff] }
  0x1b   : > { %v429_v37 = vld [vmem:[%s1025_s14 + $0x10] sm:$0xff]  ;;  %v430_v38 = vld [vmem:[%s1025_s14 + $0x18] sm:$0xff]  ;;  %v435_v47 = vld [vmem:[%s1025_s14 + $0x40] sm:$0xff] }
  0x1c   : > { %v437_v45 = vld [vmem:[%s1025_s14 + $0x50] sm:$0xff]  ;;  %v438_v46 = vld [vmem:[%s1025_s14 + $0x58] sm:$0xff]  ;;  %v436_v48 = vld [vmem:[%s1025_s14 + $0x48] sm:$0xff] }
  0x1d   : > { %v439_v55 = vld [vmem:[%s1025_s14 + $0x60] sm:$0xff]  ;;  %v440_v56 = vld [vmem:[%s1025_s14 + $0x68] sm:$0xff]  ;;  %v441_v3 = vld [vmem:[%s1025_s14 + $0x70] sm:$0xff] }
  0x1e   : > { %499 = vperm.xlu0 %911, %v457_v7   ;;  %541 = vperm.xlu1 %912, %v443_v8   ;;  %v442_v4 = vld [vmem:[%s1025_s14 + $0x78] sm:$0xff]  ;;  %v411_v5 = vld [vmem:[%s1065_s20] sm:$0xff]  ;;  %v412_v6 = vld [vmem:[%s1065_s20 + $0x8] sm:$0xff] }
  0x1f   : > { %v413_v7 = vld [vmem:[%s1065_s20 + $0x10] sm:$0xff]  ;;  %v414_v8 = vld [vmem:[%s1065_s20 + $0x18] sm:$0xff] }
  0x22   : > { %546 = vperm.xlu0 %911, %v444_v9   ;;  %551 = vperm.xlu1 %912, %v445_v10  }
  0x26   : > { %556 = vperm.xlu0 %911, %v446_v11   ;;  %561 = vperm.xlu1 %912, %v447_v12  }
  0x2a   : > { %566 = vperm.xlu0 %911, %v448_v13   ;;  %571 = vperm.xlu1 %912, %v449_v14  }
  0x2e   : > { %576 = vperm.xlu0 %911, %v450_v15   ;;  %504 = vperm.xlu1 %912, %v458_v16  }
  0x32   : > { %597 = vperm.xlu0 %911, %v459_v17   ;;  %602 = vperm.xlu1 %912, %v460_v18   ;;  %v415_v17 = vld [vmem:[%s1065_s20 + $0x20] sm:$0xff]  ;;  %v416_v18 = vld [vmem:[%s1065_s20 + $0x28] sm:$0xff] }
  0x36   : > { %607 = vperm.xlu0 %911, %v461_v19   ;;  %612 = vperm.xlu1 %912, %v462_v20   ;;  %v417_v19 = vld [vmem:[%s1065_s20 + $0x30] sm:$0xff]  ;;  %v418_v20 = vld [vmem:[%s1065_s20 + $0x38] sm:$0xff] }
  0x3a   : > { %617 = vperm.xlu0 %911, %v463_v21   ;;  %622 = vperm.xlu1 %912, %v464_v22  }
  0x3e   : > { %627 = vperm.xlu0 %911, %v465_v23   ;;  %632 = vperm.xlu1 %912, %v466_v24  }
  0x91   : > { %v480_v29 = vpop.permute.xlu1 %479  ;;  %v470_v30 = vpop.permute.xlu0 %469 }
  0x92   : > { %v511_v31 = vmul.f32 %v480_v29, %v431_v25  ;;  %v512_v32 = vmul.f32 %v480_v29, %v432_v26  ;;  %v507_v33 = vmul.f32 %v470_v30, %v427_v27  ;;  %v508_v34 = vmul.f32 %v470_v30, %v428_v28 }
  0x94   : > { %527 = vst [vmem:[%s1035_s17 + $0x20] sm:$0xff] %v511_v31  ;;  %528 = vst [vmem:[%s1035_s17 + $0x28] sm:$0xff] %v512_v32  ;;  %v419_v31 = vld [vmem:[%s1065_s20 + $0x40] sm:$0xff]  ;;  %v420_v32 = vld [vmem:[%s1065_s20 + $0x48] sm:$0xff] }
  0x95   : > { %523 = vst [vmem:[%s1035_s17] sm:$0xff] %v507_v33  ;;  %524 = vst [vmem:[%s1035_s17 + $0x8] sm:$0xff] %v508_v34  ;;  %v485_v39 = vpop.permute.xlu1 %484  ;;  %v475_v40 = vpop.permute.xlu0 %474  ;;  %v421_v33 = vld [vmem:[%s1065_s20 + $0x50] sm:$0xff]  ;;  %v422_v34 = vld [vmem:[%s1065_s20 + $0x58] sm:$0xff] }
  0x96   : > { %v513_v41 = vmul.f32 %v485_v39, %v433_v35  ;;  %v514_v42 = vmul.f32 %v485_v39, %v434_v36  ;;  %v509_v43 = vmul.f32 %v475_v40, %v429_v37  ;;  %v510_v44 = vmul.f32 %v475_v40, %v430_v38 }
  0x98   : > { %529 = vst [vmem:[%s1035_s17 + $0x30] sm:$0xff] %v513_v41  ;;  %530 = vst [vmem:[%s1035_s17 + $0x38] sm:$0xff] %v514_v42 }
  0x99   : > { %525 = vst [vmem:[%s1035_s17 + $0x10] sm:$0xff] %v509_v43  ;;  %526 = vst [vmem:[%s1035_s17 + $0x18] sm:$0xff] %v510_v44  ;;  %v495_v49 = vpop.permute.xlu1 %494  ;;  %v490_v50 = vpop.permute.xlu0 %489 }
  0x9a   : > { %v517_v51 = vmul.f32 %v495_v49, %v437_v45  ;;  %v518_v52 = vmul.f32 %v495_v49, %v438_v46  ;;  %v515_v53 = vmul.f32 %v490_v50, %v435_v47  ;;  %v516_v54 = vmul.f32 %v490_v50, %v436_v48  ;;  %v423_v45 = vld [vmem:[%s1065_s20 + $0x60] sm:$0xff]  ;;  %v424_v46 = vld [vmem:[%s1065_s20 + $0x68] sm:$0xff]  ;;  %v425_v47 = vld [vmem:[%s1065_s20 + $0x70] sm:$0xff] }
  0x9b   : > { %v426_v48 = vld [vmem:[%s1065_s20 + $0x78] sm:$0xff] }
  0x9c   : > { %533 = vst [vmem:[%s1035_s17 + $0x50] sm:$0xff] %v517_v51  ;;  %534 = vst [vmem:[%s1035_s17 + $0x58] sm:$0xff] %v518_v52 }
  0x9d   : > { %531 = vst [vmem:[%s1035_s17 + $0x40] sm:$0xff] %v515_v53  ;;  %532 = vst [vmem:[%s1035_s17 + $0x48] sm:$0xff] %v516_v54  ;;  %v500_v57 = vpop.permute.xlu0 %499  ;;  %v542_v58 = vpop.permute.xlu1 %541 }
  0x9e   : > { %v519_v59 = vmul.f32 %v500_v57, %v439_v55  ;;  %v520_v60 = vmul.f32 %v500_v57, %v440_v56  ;;  %v579_v13 = vmul.f32 %v542_v58, %v411_v5  ;;  %v580_v14 = vmul.f32 %v542_v58, %v412_v6 }
  0xa0   : > { %535 = vst [vmem:[%s1035_s17 + $0x60] sm:$0xff] %v519_v59  ;;  %536 = vst [vmem:[%s1035_s17 + $0x68] sm:$0xff] %v520_v60 }
  0xa1   : > { %v547_v61 = vpop.permute.xlu0 %546  ;;  %v552_v62 = vpop.permute.xlu1 %551 }
  0xa2   : > { %v581_v15 = vmul.f32 %v547_v61, %v413_v7  ;;  %v582_v16 = vmul.f32 %v547_v61, %v414_v8  ;;  %v583_v27 = vmul.f32 %v552_v62, %v415_v17  ;;  %v584_v28 = vmul.f32 %v552_v62, %v416_v18 }
  0xa5   : > { %v557_v63 = vpop.permute.xlu0 %556  ;;  %v562_v0 = vpop.permute.xlu1 %561 }
  0xa6   : > { %v585_v29 = vmul.f32 %v557_v63, %v417_v19  ;;  %v586_v30 = vmul.f32 %v557_v63, %v418_v20  ;;  %v587_v41 = vmul.f32 %v562_v0, %v419_v31  ;;  %v588_v42 = vmul.f32 %v562_v0, %v420_v32 }
  0xa9   : > { %v567_v1 = vpop.permute.xlu0 %566  ;;  %v1067_v2 = vpop.permute.xlu1 %571 }
  0xaa   : > { %v589_v43 = vmul.f32 %v567_v1, %v421_v33  ;;  %v590_v44 = vmul.f32 %v567_v1, %v422_v34  ;;  %v591_v55 = vmul.f32 %v1067_v2, %v423_v45  ;;  %v592_v56 = vmul.f32 %v1067_v2, %v424_v46 }
  0xad   : > { %v577_v9 = vpop.permute.xlu0 %576  ;;  %v505_v10 = vpop.permute.xlu1 %504 }
  0xae   : > { %v521_v11 = vmul.f32 %v505_v10, %v441_v3  ;;  %v522_v12 = vmul.f32 %v505_v10, %v442_v4  ;;  %v593_v57 = vmul.f32 %v577_v9, %v425_v47  ;;  %v594_v58 = vmul.f32 %v577_v9, %v426_v48 }
  0xb0   : > { %537 = vst [vmem:[%s1035_s17 + $0x70] sm:$0xff] %v521_v11  ;;  %538 = vst [vmem:[%s1035_s17 + $0x78] sm:$0xff] %v522_v12 }
  0xb1   : > { %v598_v21 = vpop.permute.xlu0 %597  ;;  %v603_v22 = vpop.permute.xlu1 %602 }
  0xb2   : > { %v635_v23 = vadd.f32 %v598_v21, %v579_v13  ;;  %v636_v24 = vadd.f32 %v598_v21, %v580_v14  ;;  %v637_v25 = vadd.f32 %v603_v22, %v581_v15  ;;  %v638_v26 = vadd.f32 %v603_v22, %v582_v16 }
  0xb4   : > { %651 = vst [vmem:[%s1085_s26] sm:$0xff] %v635_v23  ;;  %652 = vst [vmem:[%s1085_s26 + $0x8] sm:$0xff] %v636_v24 }
  0xb5   : > { %653 = vst [vmem:[%s1085_s26 + $0x10] sm:$0xff] %v637_v25  ;;  %654 = vst [vmem:[%s1085_s26 + $0x18] sm:$0xff] %v638_v26  ;;  %v608_v35 = vpop.permute.xlu0 %607  ;;  %v613_v36 = vpop.permute.xlu1 %612 }
  0xb6   : > { %v639_v37 = vadd.f32 %v608_v35, %v583_v27  ;;  %v640_v38 = vadd.f32 %v608_v35, %v584_v28  ;;  %v641_v39 = vadd.f32 %v613_v36, %v585_v29  ;;  %v642_v40 = vadd.f32 %v613_v36, %v586_v30 }
  0xb8   : > { %655 = vst [vmem:[%s1085_s26 + $0x20] sm:$0xff] %v639_v37  ;;  %656 = vst [vmem:[%s1085_s26 + $0x28] sm:$0xff] %v640_v38 }
  0xb9   : > { %657 = vst [vmem:[%s1085_s26 + $0x30] sm:$0xff] %v641_v39  ;;  %658 = vst [vmem:[%s1085_s26 + $0x38] sm:$0xff] %v642_v40  ;;  %v618_v49 = vpop.permute.xlu0 %617  ;;  %v623_v50 = vpop.permute.xlu1 %622 }
  0xba   : > { %v643_v51 = vadd.f32 %v618_v49, %v587_v41  ;;  %v644_v52 = vadd.f32 %v618_v49, %v588_v42  ;;  %v645_v53 = vadd.f32 %v623_v50, %v589_v43  ;;  %v646_v54 = vadd.f32 %v623_v50, %v590_v44 }
  0xbc   : > { %659 = vst [vmem:[%s1085_s26 + $0x40] sm:$0xff] %v643_v51  ;;  %660 = vst [vmem:[%s1085_s26 + $0x48] sm:$0xff] %v644_v52 }
  0xbd   : > { %661 = vst [vmem:[%s1085_s26 + $0x50] sm:$0xff] %v645_v53  ;;  %662 = vst [vmem:[%s1085_s26 + $0x58] sm:$0xff] %v646_v54  ;;  %v628_v59 = vpop.permute.xlu0 %627  ;;  %v633_v60 = vpop.permute.xlu1 %632 }
  0xbe   : > { %v647_v61 = vadd.f32 %v628_v59, %v591_v55  ;;  %v648_v62 = vadd.f32 %v628_v59, %v592_v56  ;;  %v649_v63 = vadd.f32 %v633_v60, %v593_v57  ;;  %v650_v0 = vadd.f32 %v633_v60, %v594_v58 }
  0xc0   : > { %663 = vst [vmem:[%s1085_s26 + $0x60] sm:$0xff] %v647_v61  ;;  %664 = vst [vmem:[%s1085_s26 + $0x68] sm:$0xff] %v648_v62 }
  0xc1   : > { %665 = vst [vmem:[%s1085_s26 + $0x70] sm:$0xff] %v649_v63  ;;  %666 = vst [vmem:[%s1085_s26 + $0x78] sm:$0xff] %v650_v0 }
  0xc2 PF: > { %s17_s23 = sadd.s32 1, %s935_s23   ;;  %s1129_s21 = smov %s931_s22 }
  0xc3   : > { %p14_p5 = scmp.ge.s32.totalorder %s17_s23, 4   ;;  %s1130_s22 = smov %s1132_s24 }
  0xc5   :  { %16 = sbr.rel (!%p14_p5) target bundleno = 2 (0x2), region = 94 }

</bundles_post_ra>
